<compile_context>
chip_gen: v5e
topology: v5e:2x2
jax: 0.10.0
libtpu: 0.0.40
codegen_flags: <defaults>
</compile_context>

<pallas_src>
import functools

import numpy as np
import jax
import jax.numpy as jnp
from jax.experimental import pallas as pl
from jax.experimental.pallas import tpu as pltpu

LANE = 128
SUBLANE = 8


def _round_up(x, m):
    return ((x + m - 1) // m) * m


def _pick_tile(n, pref):
    """Largest tile in {pref,1024,512,256,128} that divides n (n % 128 == 0)."""
    for t in (pref, 1024, 512, 256, 128):
        if t <= n and n % t == 0:
            return t
    return n


# ----------------------------------------------------------------------------
# Tiled linear (matmul) kernel
# ----------------------------------------------------------------------------

def _linear_kernel(x_ref, w_ref, *rest, nk, relu, has_bias):
    if has_bias:
        b_ref, o_ref, acc_ref = rest
    else:
        o_ref, acc_ref = rest
    k = pl.program_id(2)

    @pl.when(k == 0)
    def _():
        acc_ref[...] = jnp.zeros_like(acc_ref)

    acc_ref[...] += jnp.dot(x_ref[...], w_ref[...],
                            preferred_element_type=jnp.float32)

    @pl.when(k == nk - 1)
    def _():
        y = acc_ref[...]
        if has_bias:
            y = y + b_ref[...]
        if relu:
            y = jnp.maximum(y, 0.0)
        o_ref[...] = y.astype(o_ref.dtype)


def linear(x, w, b=None, relu=False):
    """x:(M,K) @ w:(K,N) [+ b] -> (M,N); tiled grid, f32 accumulation."""
    M, K = x.shape
    Nd = w.shape[1]
    tm = 256 if M >= 256 else _round_up(M, SUBLANE)
    tn = 256 if Nd >= 256 else _round_up(Nd, LANE)
    tk = 512 if K >= 512 else _round_up(K, LANE)
    Mp, NdP, Kp = _round_up(M, tm), _round_up(Nd, tn), _round_up(K, tk)

    xp = jnp.pad(x.astype(jnp.float32), ((0, Mp - M), (0, Kp - K)))
    wp = jnp.pad(w.astype(jnp.float32), ((0, Kp - K), (0, NdP - Nd)))
    inputs = [xp, wp]
    in_specs = [pl.BlockSpec((tm, tk), lambda i, j, k: (i, k)),
                pl.BlockSpec((tk, tn), lambda i, j, k: (k, j))]
    has_bias = b is not None
    if has_bias:
        bp = jnp.pad(b.astype(jnp.float32).reshape(1, Nd),
                     ((0, 0), (0, NdP - Nd)))
        inputs.append(bp)
        in_specs.append(pl.BlockSpec((1, tn), lambda i, j, k: (0, j)))
    nk = Kp // tk

    out = pl.pallas_call(
        functools.partial(_linear_kernel, nk=nk, relu=relu, has_bias=has_bias),
        grid=(Mp // tm, NdP // tn, nk),
        in_specs=in_specs,
        out_specs=pl.BlockSpec((tm, tn), lambda i, j, k: (i, j)),
        out_shape=jax.ShapeDtypeStruct((Mp, NdP), jnp.float32),
        scratch_shapes=[pltpu.VMEM((tm, tn), jnp.float32)],
        compiler_params=pltpu.CompilerParams(
            dimension_semantics=("parallel", "parallel", "arbitrary")),
    )(*inputs)
    return out[:M, :Nd]


# ----------------------------------------------------------------------------
# K-tiled multi-head GAT attention + aggregation kernel (online softmax)
# ----------------------------------------------------------------------------

def _gat_attn_kernel(ety_ref, el_ref, er_ref, wfeat_ref, etab_ref, *rest,
                     num_heads, head_dim, num_etypes, negative_slope, alpha,
                     has_resattn, has_resval, want_attn, apply_elu,
                     final_mean_l2):
    idx = 0
    resattn_ref = rest[idx] if has_resattn else None
    idx += int(has_resattn)
    resval_ref = rest[idx] if has_resval else None
    idx += int(has_resval)
    out_ref = rest[idx]
    idx += 1
    attn_ref = rest[idx] if want_attn else None
    idx += int(want_attn)
    m_scr = rest[idx]
    l_scr = rest[idx + 1]
    acc_scr = rest[idx + 2]
    idx += 3
    accr_scr = rest[idx] if has_resattn else None

    k = pl.program_id(1)
    nk = pl.num_programs(1)
    D = head_dim
    neg_big = jnp.float32(-1e30)

    @pl.when(k == 0)
    def _init():
        m_scr[...] = jnp.full_like(m_scr, neg_big)
        l_scr[...] = jnp.zeros_like(l_scr)
        acc_scr[...] = jnp.zeros_like(acc_scr)
        if has_resattn:
            accr_scr[...] = jnp.zeros_like(accr_scr)

    # sentinel-coded edge types: -1 means "no edge" (adjacency folded in).
    ety = ety_ref[...].astype(jnp.int32)            # (tm, tk)
    edge_mask = ety >= 0
    mask_f = edge_mask.astype(jnp.float32)
    # head-independent edge-type masks, hoisted out of the head loop.
    type_masks = [(ety == t).astype(jnp.float32) for t in range(num_etypes)]

    wf = wfeat_ref[...]                              # (tk, H*D) bf16
    er_blk = er_ref[...]                             # (tm, H)   f32

    for h in range(num_heads):
        # attention logits: el(src) + er(dst) + edge-type term
        e = er_blk[:, h:h + 1] + el_ref[h]           # (tm,1)+(1,tk) -> (tm,tk)
        ee = type_masks[0] * etab_ref[0, h]
        for t in range(1, num_etypes):
            ee = ee + type_masks[t] * etab_ref[t, h]
        e = e + ee
        e = jnp.where(e >= 0.0, e, jnp.float32(negative_slope) * e)  # leaky relu
        e = jnp.where(edge_mask, e, neg_big)

        # online softmax update (exact when nk == 1)
        m_old = m_scr[h]                             # (tm,1)
        m_new = jnp.maximum(m_old, jnp.max(e, axis=1, keepdims=True))
        corr = jnp.exp(m_old - m_new)
        p = jnp.exp(e - m_new) * mask_f              # (tm,tk)
        l_new = corr * l_scr[h] + jnp.sum(p, axis=1, keepdims=True)
        m_scr[h] = m_new
        l_scr[h] = l_new

        wf_h = wf[:, h * D:(h + 1) * D]              # (tk, D) bf16
        acc_scr[h] = corr * acc_scr[h] + jnp.dot(
            p.astype(jnp.bfloat16), wf_h, preferred_element_type=jnp.float32)
        if has_resattn:
            accr_scr[h] = accr_scr[h] + jnp.dot(
                resattn_ref[h], wf_h, preferred_element_type=jnp.float32)

        if want_attn:
            # want_attn forces nk == 1, so l_new is the final row sum -> exact.
            a = p * pl.reciprocal(
                jnp.maximum(l_new, jnp.float32(1e-30)), approx=True)
            if has_resattn:
                a = (a * jnp.float32(1.0 - alpha) +
                     resattn_ref[h].astype(jnp.float32) * jnp.float32(alpha))
            attn_ref[h] = a.astype(attn_ref.dtype)

    @pl.when(k == nk - 1)
    def _finalize():
        mean_acc = None
        for h in range(num_heads):
            # deferred softmax normalization: scale the (tm,D) accumulator.
            inv_l = pl.reciprocal(
                jnp.maximum(l_scr[h], jnp.float32(1e-30)), approx=True)
            o = acc_scr[h] * inv_l
            if has_resattn:
                o = (jnp.float32(1.0 - alpha) * o +
                     jnp.float32(alpha) * accr_scr[h])
            if has_resval:
                o = o + resval_ref[...][:, h * D:(h + 1) * D]
            if apply_elu:
                o = jnp.where(o > 0.0, o,
                              jnp.exp(jnp.minimum(o, 0.0)) - 1.0)
            if final_mean_l2:
                mean_acc = o if mean_acc is None else mean_acc + o
            else:
                out_ref[h] = o.astype(out_ref.dtype)
        if final_mean_l2:
            m = mean_acc * jnp.float32(1.0 / num_heads)
            nrm = jnp.sqrt(jnp.sum(m * m, axis=1, keepdims=True))
            out_ref[...] = m * pl.reciprocal(
                jnp.maximum(nrm, jnp.float32(1e-12)), approx=False)


def gat_attention(ety, el, er, wfeat, etab, resattn, resval, *, num_heads,
                  head_dim, negative_slope, alpha, apply_elu, want_attn,
                  final_mean_l2, tm=128, tk=512):
    Np = ety.shape[0]
    H, D = num_heads, head_dim
    tm = _pick_tile(Np, tm)
    # Layers that must emit the attention map need the full row per step for an
    # exact normalized store; all other layers are K-tiled (online softmax).
    tk = Np if want_attn else _pick_tile(Np, tk)
    nk = Np // tk
    grid = (Np // tm, nk)

    in_specs = [
        pl.BlockSpec((tm, tk), lambda i, k: (i, k)),          # etype  int8
        pl.BlockSpec((H, 1, tk), lambda i, k: (0, 0, k)),     # el     f32
        pl.BlockSpec((tm, H), lambda i, k: (i, 0)),           # er     f32
        pl.BlockSpec((tk, H * D), lambda i, k: (k, 0)),       # wfeat  bf16
        pl.BlockSpec(memory_space=pltpu.MemorySpace.SMEM),    # (T, H) table
    ]
    inputs = [ety, el, er, wfeat, etab]
    if resattn is not None:
        in_specs.append(pl.BlockSpec((H, tm, tk), lambda i, k: (0, i, k)))
        inputs.append(resattn)
    if resval is not None:
        in_specs.append(pl.BlockSpec((tm, H * D), lambda i, k: (i, 0)))
        inputs.append(resval)

    if final_mean_l2:
        out_spec0 = pl.BlockSpec((tm, D), lambda i, k: (i, 0))
        out_shape0 = jax.ShapeDtypeStruct((Np, D), jnp.float32)
    else:
        out_spec0 = pl.BlockSpec((H, tm, D), lambda i, k: (0, i, 0))
        out_shape0 = jax.ShapeDtypeStruct((H, Np, D), jnp.float32)

    if want_attn:
        out_specs = (out_spec0,
                     pl.BlockSpec((H, tm, tk), lambda i, k: (0, i, k)))
        out_shape = (out_shape0,
                     jax.ShapeDtypeStruct((H, Np, Np), jnp.bfloat16))
    else:
        out_specs = out_spec0
        out_shape = out_shape0

    scratch = [pltpu.VMEM((H, tm, 1), jnp.float32),   # running max
               pltpu.VMEM((H, tm, 1), jnp.float32),   # running sum
               pltpu.VMEM((H, tm, D), jnp.float32)]   # softmax accumulator
    if resattn is not None:
        scratch.append(pltpu.VMEM((H, tm, D), jnp.float32))  # res_attn acc

    kernel = functools.partial(
        _gat_attn_kernel, num_heads=H, head_dim=D, num_etypes=etab.shape[0],
        negative_slope=negative_slope, alpha=alpha,
        has_resattn=resattn is not None, has_resval=resval is not None,
        want_attn=want_attn, apply_elu=apply_elu, final_mean_l2=final_mean_l2)

    res = pl.pallas_call(
        kernel, grid=grid, in_specs=in_specs, out_specs=out_specs,
        out_shape=out_shape, scratch_shapes=scratch,
        compiler_params=pltpu.CompilerParams(
            dimension_semantics=("parallel", "arbitrary"),
            vmem_limit_bytes=48 * 1024 * 1024),
    )(*inputs)

    if want_attn:
        out, attn = res
    else:
        out, attn = res, None
    if not final_mean_l2:
        # tiny O(Np*H*D) reshape; avoids in-kernel lane-concat of head outputs
        out = jnp.transpose(out, (1, 0, 2)).reshape(Np, H * D)
    return out, attn


# ----------------------------------------------------------------------------
# Fused projection head: Linear -> ReLU -> Linear in one kernel
# ----------------------------------------------------------------------------

def _proj_head_kernel(x_ref, w1_ref, b1_ref, w2_ref, b2_ref, o_ref):
    h1 = jnp.dot(x_ref[...], w1_ref[...], preferred_element_type=jnp.float32)
    h1 = jnp.maximum(h1 + b1_ref[...], 0.0)
    o = jnp.dot(h1, w2_ref[...], preferred_element_type=jnp.float32)
    o_ref[...] = o + b2_ref[...]


def proj_head(x, w1, b1, w2, b2):
    M, K = x.shape
    Dh, Do = w1.shape[1], w2.shape[1]
    tm = 256 if M >= 256 else _round_up(M, SUBLANE)
    Mp, Kp = _round_up(M, tm), _round_up(K, LANE)
    Dhp, Dop = _round_up(Dh, LANE), _round_up(Do, LANE)

    xp = jnp.pad(x.astype(jnp.float32), ((0, Mp - M), (0, Kp - K)))
    w1p = jnp.pad(w1, ((0, Kp - K), (0, Dhp - Dh)))
    b1p = jnp.pad(b1.reshape(1, Dh), ((0, 0), (0, Dhp - Dh)))
    w2p = jnp.pad(w2, ((0, Dhp - Dh), (0, Dop - Do)))
    b2p = jnp.pad(b2.reshape(1, Do), ((0, 0), (0, Dop - Do)))

    out = pl.pallas_call(
        _proj_head_kernel,
        grid=(Mp // tm,),
        in_specs=[
            pl.BlockSpec((tm, Kp), lambda i: (i, 0)),
            pl.BlockSpec((Kp, Dhp), lambda i: (0, 0)),
            pl.BlockSpec((1, Dhp), lambda i: (0, 0)),
            pl.BlockSpec((Dhp, Dop), lambda i: (0, 0)),
            pl.BlockSpec((1, Dop), lambda i: (0, 0)),
        ],
        out_specs=pl.BlockSpec((tm, Dop), lambda i: (i, 0)),
        out_shape=jax.ShapeDtypeStruct((Mp, Dop), jnp.float32),
        compiler_params=pltpu.CompilerParams(
            dimension_semantics=("parallel",)),
    )(xp, w1p, b1p, w2p, b2p)
    return out[:M, :Do]


# ----------------------------------------------------------------------------
# Parameter init (deterministic, in-script)
# ----------------------------------------------------------------------------

def xavier_normal(key, shape, gain=1.414):
    fan_in, fan_out = shape[0], shape[1]
    std = gain * (2.0 / (fan_in + fan_out)) ** 0.5
    return std * jax.random.normal(key, shape, dtype=jnp.float32)


def init_params(key, in_dims, num_hidden, num_classes, num_layers, heads,
                edge_dim, num_etypes, negative_slope, alpha, residual):
    keys = iter(jax.random.split(key, 256))
    params = {"num_layers": num_layers}

    fc_list = []
    for in_dim in in_dims:
        W = xavier_normal(next(keys), (in_dim, num_hidden))
        b = 0.01 * jax.random.normal(next(keys), (num_hidden,), jnp.float32)
        fc_list.append((W, b))
    params["fc_list"] = fc_list

    cfgs = [(num_hidden, num_hidden, heads[0], False)]
    for l in range(1, num_layers):
        cfgs.append((num_hidden * heads[l - 1], num_hidden, heads[l], residual))
    cfgs.append((num_hidden * heads[-2], num_classes, heads[-1], residual))

    gat_layers = []
    for (fin, fout, H, res) in cfgs:
        lp = {
            "num_heads": H, "out_feats": fout,
            "negative_slope": negative_slope, "alpha": alpha,
            "W_fc": xavier_normal(next(keys), (fin, H * fout)),
            "attn_l": xavier_normal(next(keys), (H, fout)),
            "attn_r": xavier_normal(next(keys), (H, fout)),
            "attn_e": xavier_normal(next(keys), (H, edge_dim)),
            "edge_emb": jax.random.normal(next(keys), (num_etypes, edge_dim),
                                          jnp.float32),
            "W_fce": xavier_normal(next(keys), (edge_dim, H * edge_dim)),
            "W_res": (xavier_normal(next(keys), (fin, H * fout))
                      if res else None),
        }
        gat_layers.append(lp)
    params["gat_layers"] = gat_layers

    proj_in = num_hidden * heads[-2]
    params["proj_W1"] = xavier_normal(next(keys), (proj_in, 64))
    params["proj_b1"] = 0.01 * jax.random.normal(next(keys), (64,), jnp.float32)
    params["proj_W2"] = xavier_normal(next(keys), (64, 64))
    params["proj_b2"] = 0.01 * jax.random.normal(next(keys), (64,), jnp.float32)
    return params


# ----------------------------------------------------------------------------
# Model forward (glue around the Pallas kernels)
# ----------------------------------------------------------------------------

def gat_conv_layer(lp, h_in, ety_p, res_attn, Np, *, apply_elu, want_attn,
                   final_mean_l2):
    N = h_in.shape[0]
    pad_n = Np - N
    H, D = lp["num_heads"], lp["out_feats"]

    # node projection (no bias in myGATConv fc) -> lane-dense per-head features
    feat = linear(h_in, lp["W_fc"])                       # (N, H*D) f32
    feat3 = feat.reshape(N, H, D)
    wfeat = jnp.pad(feat, ((0, pad_n), (0, 0))).astype(jnp.bfloat16)  # (Np,H*D)

    # per-node attention terms (tiny N*H tensors; XLA glue)
    el = jnp.einsum("nhd,hd->hn", feat3, lp["attn_l"])            # (H, N) src
    er = jnp.einsum("nhd,hd->nh", feat3, lp["attn_r"])            # (N, H) dst
    el = jnp.pad(el, ((0, 0), (0, pad_n)))[:, None, :]            # (H, 1, Np)
    er = jnp.pad(er, ((0, pad_n), (0, 0)))                        # (Np, H)

    # per-edge-type attention contribution table (T, H); tiny matmuls stay XLA.
    T, edim = lp["edge_emb"].shape
    eproj = jnp.dot(lp["edge_emb"], lp["W_fce"]).reshape(T, H, edim)
    etab = jnp.einsum("the,he->th", eproj, lp["attn_e"])          # (T, H)

    resval = None
    if lp["W_res"] is not None:
        rv = linear(h_in, lp["W_res"])                            # (N, H*D)
        resval = jnp.pad(rv, ((0, pad_n), (0, 0)))                # (Np, H*D)

    return gat_attention(
        ety_p, el, er, wfeat, etab, res_attn, resval,
        num_heads=H, head_dim=D,
        negative_slope=float(lp["negative_slope"]), alpha=float(lp["alpha"]),
        apply_elu=apply_elu, want_attn=want_attn,
        final_mean_l2=final_mean_l2)


def my_weight_gat_forward(params, features_list, adj, etype, p=0.5):
    # 1) per-type input projections + concat over nodes
    hs = [linear(f, W, b) for (W, b), f in zip(params["fc_list"], features_list)]
    h = jnp.concatenate(hs, axis=0)
    N = h.shape[0]

    # 2) random feature-column masking; deterministic stand-in for
    #    np.random.choice in get_feat_mask.
    if p > 0:
        D = h.shape[1]
        num_mask = int(D * p)
        perm = jax.random.permutation(jax.random.PRNGKey(123), D)
        mask = jnp.zeros((D,), jnp.float32).at[perm[:num_mask]].set(1.0)
        h = h * (1.0 - mask)[None, :]

    # pad graph once; adjacency folded into int8 etype with sentinel -1
    # (padded rows/cols are non-edges).  TODO(synk): if num_etypes > 127,
    # fall back to int16/int32 edge-type storage.
    Np = _round_up(N, LANE)
    pad_n = Np - N
    ety_c = jnp.where(adj > 0, etype.astype(jnp.int32), -1)
    ety_p = jnp.pad(ety_c, ((0, pad_n), (0, pad_n)),
                    constant_values=-1).astype(jnp.int8)

    # 3) hidden GAT layers (ELU in-kernel); output already flattened over heads.
    #    The reference passes res_attn=None to the final layer, so the last
    #    hidden layer's attention map is never consumed -> skip writing it.
    res_attn = None
    num_layers = params["num_layers"]
    for l in range(num_layers):
        want_attn = l < num_layers - 1
        h_out, res_attn = gat_conv_layer(
            params["gat_layers"][l], h, ety_p, res_attn, Np,
            apply_elu=True, want_attn=want_attn, final_mean_l2=False)
        h = h_out[:N]

    # 4) output GAT layer: head-mean + L2-normalize fused into kernel epilogue
    logits_p, _ = gat_conv_layer(
        params["gat_layers"][-1], h, ety_p, None, Np,
        apply_elu=False, want_attn=False, final_mean_l2=True)
    logits = logits_p[:N]

    # 5) projection head: Linear -> ReLU -> Linear fused into one kernel
    hproj = proj_head(h, params["proj_W1"], params["proj_b1"],
                      params["proj_W2"], params["proj_b2"])
    return logits, hproj


# ----------------------------------------------------------------------------
# Example run
# ----------------------------------------------------------------------------

if __name__ == "__main__":
    in_dims = [8, 12]           # two node types
    nodes_per_type = [12, 12]   # N = 24 nodes total
    num_hidden = 16
    num_classes = 5
    num_layers = 2
    heads = [2, 2, 1]
    edge_dim = 8
    num_etypes = 3
    negative_slope = 0.2
    alpha = 0.05
    residual = True

    N = sum(nodes_per_type)

    # deterministic dense graph with self-loops (row = dst, col = src)
    adj_np = np.zeros((N, N), np.float32)
    ety_np = np.zeros((N, N), np.int32)
    for i in range(N):
        adj_np[i, i] = 1.0; ety_np[i, i] = 0
        j = (i + 1) % N; adj_np[i, j] = 1.0; ety_np[i, j] = 1
        j = (i + 5) % N; adj_np[i, j] = 1.0; ety_np[i, j] = 2
    adj = jnp.asarray(adj_np)
    etype = jnp.asarray(ety_np)

    key = jax.random.PRNGKey(0)
    kf1, kf2, kp = jax.random.split(key, 3)
    features_list = [
        jax.random.normal(kf1, (nodes_per_type[0], in_dims[0]), jnp.float32),
        jax.random.normal(kf2, (nodes_per_type[1], in_dims[1]), jnp.float32),
    ]

    params = init_params(kp, in_dims, num_hidden, num_classes, num_layers,
                         heads, edge_dim, num_etypes, negative_slope, alpha,
                         residual)

    logits, h_proj = my_weight_gat_forward(params, features_list, adj, etype,
                                           p=0.5)
    jax.block_until_ready((logits, h_proj))
    assert logits.shape == (N, num_classes)
    assert h_proj.shape == (N, 64)
    assert bool(jnp.all(jnp.isfinite(logits)))
    assert bool(jnp.all(jnp.isfinite(h_proj)))
    print("KERNEL_OK")
</pallas_src>

<mosaic_0001>
module attributes {stable_mosaic.version = 11 : i64} {
  func.func @_linear_kernel(%arg0: i32, %arg1: i32, %arg2: i32, %arg3: memref<16x128xf32, #tpu.memory_space<vmem>>, %arg4: memref<128x128xf32, #tpu.memory_space<vmem>>, %arg5: memref<1x128xf32, #tpu.memory_space<vmem>>, %arg6: memref<16x128xf32, #tpu.memory_space<vmem>>, %arg7: memref<16x128xf32, #tpu.memory_space<vmem>>) attributes {dimension_semantics = [#tpu.dimension_semantics<parallel>, #tpu.dimension_semantics<parallel>, #tpu.dimension_semantics<arbitrary>], iteration_bounds = array<i64: 1, 1, 1>, scalar_prefetch = 0 : i64, scratch_operands = 1 : i64, tpu.core_type = #tpu.core_type<tc>, window_params = [{transform_indices = @transform_0, window_bounds = array<i64: 16, 128>}, {transform_indices = @transform_1, window_bounds = array<i64: 128, 128>}, {transform_indices = @transform_2, window_bounds = array<i64: 1, 128>}, {transform_indices = @transform_3, window_bounds = array<i64: 16, 128>}]} {
    %c0_i32 = arith.constant 0 : i32
    %0 = arith.cmpi eq, %arg2, %c0_i32 : i32
    %1 = arith.extui %0 : i1 to i32
    %c0_i32_0 = arith.constant 0 : i32
    %2 = arith.cmpi ne, %1, %c0_i32_0 : i32
    scf.if %2 {
      %cst_10 = arith.constant 0.000000e+00 : f32
      %12 = vector.broadcast %cst_10 : f32 to vector<16x128xf32>
      %c0_11 = arith.constant 0 : index
      %c0_12 = arith.constant 0 : index
      %13 = vector.load %arg7[%c0_11, %c0_12] : memref<16x128xf32, #tpu.memory_space<vmem>>, vector<16x128xf32>
      tpu.vector_store %arg7[%c0_11, %c0_12], %12 {strides = array<i32>} : memref<16x128xf32, #tpu.memory_space<vmem>>, vector<16x128xf32>,
    } else {
    }
    %c0 = arith.constant 0 : index
    %c0_1 = arith.constant 0 : index
    %3 = vector.load %arg7[%c0, %c0_1] : memref<16x128xf32, #tpu.memory_space<vmem>>, vector<16x128xf32>
    %c0_2 = arith.constant 0 : index
    %c0_3 = arith.constant 0 : index
    %4 = vector.load %arg3[%c0_2, %c0_3] : memref<16x128xf32, #tpu.memory_space<vmem>>, vector<16x128xf32>
    %c0_4 = arith.constant 0 : index
    %c0_5 = arith.constant 0 : index
    %5 = vector.load %arg4[%c0_4, %c0_5] : memref<128x128xf32, #tpu.memory_space<vmem>>, vector<128x128xf32>
    %cst = arith.constant dense<0.000000e+00> : vector<16x128xf32>
    %6 = tpu.matmul %4, %5, %cst {dimension_numbers = #tpu.dot_dimension_numbers<[1], [0], [0], [1], [0, 0, 1, 1], [], []>} : vector<16x128xf32>, vector<128x128xf32>, vector<16x128xf32> -> vector<16x128xf32>
    %7 = arith.addf %3, %6 : vector<16x128xf32>
    %c0_6 = arith.constant 0 : index
    %c0_7 = arith.constant 0 : index
    %8 = vector.load %arg7[%c0_6, %c0_7] : memref<16x128xf32, #tpu.memory_space<vmem>>, vector<16x128xf32>
    tpu.vector_store %arg7[%c0_6, %c0_7], %7 {strides = array<i32>} : memref<16x128xf32, #tpu.memory_space<vmem>>, vector<16x128xf32>,
    %c0_i32_8 = arith.constant 0 : i32
    %9 = arith.cmpi eq, %arg2, %c0_i32_8 : i32
    %10 = arith.extui %9 : i1 to i32
    %c0_i32_9 = arith.constant 0 : i32
    %11 = arith.cmpi ne, %10, %c0_i32_9 : i32
    scf.if %11 {
      %c0_10 = arith.constant 0 : index
      %c0_11 = arith.constant 0 : index
      %12 = vector.load %arg7[%c0_10, %c0_11] : memref<16x128xf32, #tpu.memory_space<vmem>>, vector<16x128xf32>
      %c0_12 = arith.constant 0 : index
      %c0_13 = arith.constant 0 : index
      %13 = vector.load %arg5[%c0_12, %c0_13] : memref<1x128xf32, #tpu.memory_space<vmem>>, vector<1x128xf32>
      %14 = vector.broadcast %13 : vector<1x128xf32> to vector<16x128xf32>
      %15 = arith.addf %12, %14 : vector<16x128xf32>
      %c0_14 = arith.constant 0 : index
      %c0_15 = arith.constant 0 : index
      %16 = vector.load %arg6[%c0_14, %c0_15] : memref<16x128xf32, #tpu.memory_space<vmem>>, vector<16x128xf32>
      tpu.vector_store %arg6[%c0_14, %c0_15], %15 {strides = array<i32>} : memref<16x128xf32, #tpu.memory_space<vmem>>, vector<16x128xf32>,
    } else {
    }
    return
  }
  func.func @transform_0(%arg0: i32, %arg1: i32, %arg2: i32) -> (i32, i32) {
    %c0_i32 = arith.constant 0 : i32
    return %arg0, %arg2 : i32, i32
  }
  func.func @transform_1(%arg0: i32, %arg1: i32, %arg2: i32) -> (i32, i32) {
    %c0_i32 = arith.constant 0 : i32
    return %arg2, %arg1 : i32, i32
  }
  func.func @transform_2(%arg0: i32, %arg1: i32, %arg2: i32) -> (i32, i32) {
    %c0_i32 = arith.constant 0 : i32
    %c0_i32_0 = arith.constant 0 : i32
    return %c0_i32, %arg1 : i32, i32
  }
  func.func @transform_3(%arg0: i32, %arg1: i32, %arg2: i32) -> (i32, i32) {
    %c0_i32 = arith.constant 0 : i32
    return %arg0, %arg1 : i32, i32
  }
}

</mosaic_0001>

<bundles_post_ra>
// kernel: tpu_custom_call.1
= control target key start
LH: loop header
LB: loop body
LE: loop exit
PB: predicated region body
PF: predicated region fallthrough
CT: control target
= control target key end

     0   :  { %8 = vsyncpa [#allocation4], 0  ;;  %s279_s0 = inlined_call_operand.hbm [shape: f32[16,128], index: 0, kind: input, shape index: {}]   ;;  %s280_s1 = inlined_call_operand.hbm [shape: f32[128,128], index: 1, kind: input, shape index: {}]   ;;  %s281_s2 = inlined_call_operand.vmem [shape: f32[1,128], index: 2, kind: input, shape index: {}]   ;;  %s282_s3 = inlined_call_operand.hbm [shape: f32[16,128], index: 3, kind: output, shape index: {}]  }
   0x1   :  { %9 = vsyncpa [#allocation7], 0 }
   0x2   :  { %10 = vsyncpa [#allocation5], 0  ;;  %s15_s14 = sshll.u32 %s279_s0, 4  ;;  %s233_s15 = smov [#allocation3]   ;;  %s16_s14 = int_to_ptr.hbm [resolvable:$true] %s15_s14 }
   0x3   :  { %s17_s16 = sshll.u32 %s233_s15, 4  ;;  %s28_s19 = sshll.u32 %s280_s1, 4  ;;  %s18_s16 = int_to_ptr.vmem [resolvable:$true] %s17_s16  ;;  %s29_s19 = int_to_ptr.hbm [resolvable:$true] %s28_s19 }
   0x4   :  { %s234_s20 = smov 128   ;;  %s235_s21 = smov 8  }
   0x5   :  { %23 = dma.hbm_to_vmem [thread:$0]  %s16_s14, 256, %s18_s16, [#allocation4], %s234_s20, %s234_s20, %s235_s21  }
   0x6   :  { %s236_s22 = smov [#allocation6]  }
   0x7   :  { %s30_s23 = sshll.u32 %s236_s22, 4  ;;  %s31_s23 = int_to_ptr.vmem [resolvable:$true] %s30_s23 }
   0x8   :  { %36 = dma.hbm_to_vmem [thread:$0]  %s29_s19, 2048, %s31_s23, [#allocation7], %s234_s20, %s234_s20, %s235_s21  }
   0x9   :  { %227 = dma.done.wait [#allocation4], 256  }
   0xa   :  { %228 = vsyncadd [#allocation4], 4294967040 }
   0xb   :  { %229 = dma.done.wait [#allocation7], 2048  }
   0xc   :  { %230 = vsyncadd [#allocation7], 4294965248  ;;  %v72_v0 = vld [vmem:[#allocation6 + $0x78] sm:$0xff]  ;;  %v71_v1 = vld [vmem:[#allocation6 + $0x70] sm:$0xff]  ;;  %s237_s24 = smov [#allocation8]   ;;  %s119_s28 = sshll.u32 %s282_s3, 4  ;;  %s120_s28 = int_to_ptr.hbm [resolvable:$true] %s119_s28 }
   0xd   :  { %73 = vmatpush.msra.mxu0 %v72_v0  ;;  %133 = vmatpush.msra.mxu1 %v72_v0  ;;  %v70_v2 = vld [vmem:[#allocation6 + $0x68] sm:$0xff]  ;;  %v69_v3 = vld [vmem:[#allocation6 + $0x60] sm:$0xff]  ;;  %v68_v4 = vld [vmem:[#allocation6 + $0x58] sm:$0xff]  ;;  %s117_s25 = sshll.u32 %s237_s24, 4  ;;  %s118_s25 = int_to_ptr.vmem [resolvable:$true] %s117_s25 }
   0xe   :  { %v67_v5 = vld [vmem:[#allocation6 + $0x50] sm:$0xff]  ;;  %v66_v6 = vld [vmem:[#allocation6 + $0x48] sm:$0xff]  ;;  %v65_v7 = vld [vmem:[#allocation6 + $0x40] sm:$0xff] }
   0xf   :  { %74 = vmatpush.msra.mxu0 %v71_v1  ;;  %134 = vmatpush.msra.mxu1 %v71_v1  ;;  %v64_v8 = vld [vmem:[#allocation6 + $0x38] sm:$0xff]  ;;  %v63_v9 = vld [vmem:[#allocation6 + $0x30] sm:$0xff]  ;;  %v62_v10 = vld [vmem:[#allocation6 + $0x28] sm:$0xff] }
  0x10   :  { %v61_v11 = vld [vmem:[#allocation6 + $0x20] sm:$0xff]  ;;  %v60_v12 = vld [vmem:[#allocation6 + $0x18] sm:$0xff]  ;;  %v59_v13 = vld [vmem:[#allocation6 + $0x10] sm:$0xff] }
  0x11   :  { %75 = vmatpush.msra.mxu0 %v70_v2  ;;  %135 = vmatpush.msra.mxu1 %v70_v2  ;;  %v58_v14 = vld [vmem:[#allocation6 + $0x8] sm:$0xff]  ;;  %v57_v15 = vld [vmem:[#allocation6] sm:$0xff]  ;;  %v55_v16 = vld [vmem:[#allocation3] sm:$0xff] }
  0x12   :  { %v56_v17 = vld [vmem:[#allocation3 + $0x8] sm:$0xff]  ;;  %v154_v18 = vld [vmem:[%s281_s2] ss:$0 sm:$0xff] }
  0x13   :  { %76 = vmatpush.msra.mxu0 %v69_v3  ;;  %136 = vmatpush.msra.mxu1 %v69_v3 }
  0x15   :  { %77 = vmatpush.msra.mxu0 %v68_v4  ;;  %137 = vmatpush.msra.mxu1 %v68_v4 }
  0x17   :  { %78 = vmatpush.msra.mxu0 %v67_v5  ;;  %138 = vmatpush.msra.mxu1 %v67_v5 }
  0x19   :  { %79 = vmatpush.msra.mxu0 %v66_v6  ;;  %139 = vmatpush.msra.mxu1 %v66_v6 }
  0x1b   :  { %80 = vmatpush.msra.mxu0 %v65_v7  ;;  %140 = vmatpush.msra.mxu1 %v65_v7 }
  0x1d   :  { %81 = vmatpush.msra.mxu0 %v64_v8  ;;  %141 = vmatpush.msra.mxu1 %v64_v8 }
  0x1f   :  { %82 = vmatpush.msra.mxu0 %v63_v9  ;;  %142 = vmatpush.msra.mxu1 %v63_v9 }
  0x21   :  { %83 = vmatpush.msra.mxu0 %v62_v10  ;;  %143 = vmatpush.msra.mxu1 %v62_v10 }
  0x23   :  { %84 = vmatpush.msra.mxu0 %v61_v11  ;;  %144 = vmatpush.msra.mxu1 %v61_v11 }
  0x25   :  { %85 = vmatpush.msra.mxu0 %v60_v12  ;;  %145 = vmatpush.msra.mxu1 %v60_v12 }
  0x27   :  { %86 = vmatpush.msra.mxu0 %v59_v13  ;;  %146 = vmatpush.msra.mxu1 %v59_v13 }
  0x29   :  { %87 = vmatpush.msra.mxu0 %v58_v14  ;;  %147 = vmatpush.msra.mxu1 %v58_v14 }
  0x2b   :  { %88 = vmatpush.msra.mxu0 %v57_v15  ;;  %148 = vmatpush.msra.mxu1 %v57_v15 }
  0x2c   :  { %89 = vmatmul.f32.vlgmr.msra.gmra.mxu0 %v55_v16  ;;  %92 = vmatmul.f32.vlgmr.msra.gmra.mxu1 %v56_v17 }
  0xa9   :  { %v90_v19 = vpop.f32.mrf.mxu0  ;;  %v93_v20 = vpop.f32.mrf.mxu1 }
  0xaa   :  { %v109_v21 = vadd.f32 %v154_v18, %v90_v19  ;;  %v110_v22 = vadd.f32 %v154_v18, %v93_v20 }
  0xac   :  { %111 = vst [vmem:[#allocation8] sm:$0xff] %v109_v21 }
  0xad   :  { %112 = vst [vmem:[#allocation8 + $0x8] sm:$0xff] %v110_v22 }
  0xae   :  { %125 = dma.vmem_to_hbm [thread:$0]  %s118_s25, 256, %s120_s28, [#allocation5], %s234_s20, %s234_s20, %s235_s21  }
  0xaf   :  { %231 = dma.done.wait [#allocation5], 256  }
  0xb0   :  { %232 = vsyncadd [#allocation5], 4294967040 }
  0xb1   :  { %130 = vsyncpa [#allocation4], 1 }
  0xb2   :  { %131 = vsyncpa [#allocation7], 1 }
  0xb3   :  { %132 = vsyncpa [#allocation5], 1 }

</bundles_post_ra>
